<compile_context>
chip_gen: v7x
topology: tpu7x:2x2x1
jax: 0.10.0
libtpu: 0.0.40
codegen_flags: <defaults>
</compile_context>

<pallas_src>
import functools
import math

import jax
import jax.numpy as jnp
from jax import lax
from jax.experimental import pallas as pl
from jax.experimental.pallas import tpu as pltpu


def _round_up(x, m):
    return ((x + m - 1) // m) * m


def _pick_tile(dim, candidates):
    for c in candidates:
        if dim % c == 0:
            return c
    return dim


# -----------------------------------------------------------------------------
# Kernel 1: projection  h = x @ W   (row-tiled, MXU, f32 accumulation)
# -----------------------------------------------------------------------------
def _projection_kernel(x_ref, w_ref, h_ref):
    h_ref[...] = jnp.dot(x_ref[...], w_ref[...],
                         preferred_element_type=jnp.float32)


def _project(x_pad, w_pad, *, tm):
    n_pad, d_pad = x_pad.shape
    _, h_dim = w_pad.shape
    grid = (n_pad // tm,)
    return pl.pallas_call(
        _projection_kernel,
        out_shape=jax.ShapeDtypeStruct((n_pad, h_dim), jnp.float32),
        grid_spec=pltpu.PrefetchScalarGridSpec(
            num_scalar_prefetch=0,
            grid=grid,
            in_specs=[
                pl.BlockSpec((tm, d_pad), lambda i: (i, 0),
                             memory_space=pltpu.MemorySpace.VMEM),
                pl.BlockSpec((d_pad, h_dim), lambda i: (0, 0),
                             memory_space=pltpu.MemorySpace.VMEM),
            ],
            out_specs=pl.BlockSpec((tm, h_dim), lambda i: (i, 0),
                                   memory_space=pltpu.MemorySpace.VMEM),
        ),
        compiler_params=pltpu.CompilerParams(
            dimension_semantics=("parallel",),
            vmem_limit_bytes=48 * 1024 * 1024,
        ),
        cost_estimate=pl.CostEstimate(
            flops=2 * n_pad * d_pad * h_dim,
            transcendentals=0,
            bytes_accessed=4 * (n_pad * d_pad + d_pad * h_dim + n_pad * h_dim),
        ),
    )(x_pad, w_pad)


# -----------------------------------------------------------------------------
# Kernel 2: A = softmax(h h^T, axis=1), tiled (tm row-strip resident in VMEM)
# -----------------------------------------------------------------------------
def _adjacency_kernel(n_true, tn, hi_ref, hj_ref, a_ref):
    j = pl.program_id(1)
    n_col_tiles = pl.num_programs(1)

    # Gram tile (tm, tn): contract the shared hidden dim directly — no h.T,
    # no XLU transpose, operands feed the MXU as-is.
    s = lax.dot_general(
        hi_ref[...], hj_ref[...],
        dimension_numbers=(((1,), (1,)), ((), ())),
        preferred_element_type=jnp.float32)

    start = pl.multiple_of(j * tn, tn)           # lane-aligned (tn % 128 == 0)
    a_ref[:, pl.ds(start, tn)] = s

    # Finalize: row-wise softmax over the full resident strip on the last
    # column tile (all raw scores for these rows are now in VMEM).
    @pl.when(j == n_col_tiles - 1)
    def _():
        a = a_ref[...]
        tm, n_pad = a.shape
        if n_true != n_pad:
            # Padded (zero) columns must not contribute to the softmax.
            col = lax.broadcasted_iota(jnp.int32, (tm, n_pad), 1)
            a = jnp.where(col < n_true, a, -1e30)
        m = jnp.max(a, axis=1, keepdims=True)
        e = jnp.exp(a - m)
        denom = jnp.sum(e, axis=1, keepdims=True)
        # Approx reciprocal on the EUP (cheap) + one Newton step on the tiny
        # (tm, 1) vector so accuracy stays at f32 level; broadcast-multiply
        # replaces the full-strip divide.
        inv = pl.reciprocal(denom, approx=True)
        inv = inv * (2.0 - denom * inv)
        a_ref[...] = e * inv


def adjacency_forward(x, w):
    """softmax((x @ W)(x @ W)^T, axis=1) — matches Adjacency.forward."""
    n, d_in = x.shape
    d_in_w, hidden = w.shape
    assert d_in == d_in_w

    # Lane-dense padding (multiples of 128 on every axis that hits lanes).
    n_pad = _round_up(n, 128)
    d_pad = _round_up(d_in, 128)
    h_pad = _round_up(hidden, 128)

    x_pad = jnp.zeros((n_pad, d_pad), jnp.float32).at[:n, :d_in].set(
        x.astype(jnp.float32))
    w_pad = jnp.zeros((d_pad, h_pad), jnp.float32).at[:d_in, :hidden].set(
        w.astype(jnp.float32))

    tm = _pick_tile(n_pad, (256, 128))           # output row-tile
    tn = _pick_tile(n_pad, (1024, 512, 256, 128))  # score column-tile

    # Stage 1: h = x @ W (computed once, reused for both operands of the Gram).
    h = _project(x_pad, w_pad, tm=tm)

    # Stage 2: tiled Gram + row softmax. Output strip (tm, n_pad) is resident
    # across the column axis; row axis is parallel (megacore-shardable).
    grid = (n_pad // tm, n_pad // tn)
    kernel = functools.partial(_adjacency_kernel, n, tn)
    a_pad = pl.pallas_call(
        kernel,
        out_shape=jax.ShapeDtypeStruct((n_pad, n_pad), jnp.float32),
        grid_spec=pltpu.PrefetchScalarGridSpec(
            num_scalar_prefetch=0,
            grid=grid,
            in_specs=[
                pl.BlockSpec((tm, h_pad), lambda i, j: (i, 0),
                             memory_space=pltpu.MemorySpace.VMEM),
                pl.BlockSpec((tn, h_pad), lambda i, j: (j, 0),
                             memory_space=pltpu.MemorySpace.VMEM),
            ],
            out_specs=pl.BlockSpec((tm, n_pad), lambda i, j: (i, 0),
                                   memory_space=pltpu.MemorySpace.VMEM),
        ),
        compiler_params=pltpu.CompilerParams(
            dimension_semantics=("parallel", "arbitrary"),
            vmem_limit_bytes=48 * 1024 * 1024,
        ),
        cost_estimate=pl.CostEstimate(
            flops=2 * n_pad * n_pad * h_pad + 5 * n_pad * n_pad,
            transcendentals=n_pad * n_pad,
            bytes_accessed=4 * (2 * n_pad * h_pad + n_pad * n_pad),
        ),
    )(h, h)

    return a_pad[:n, :n]


def make_weight(key, input_dim, hidden_dim):
    # Matches Adjacency.reset_parameters: uniform(-stdv, stdv), stdv = 1/sqrt(hidden_dim)
    stdv = 1.0 / math.sqrt(hidden_dim)
    return jax.random.uniform(
        key, (input_dim, hidden_dim), dtype=jnp.float32, minval=-stdv, maxval=stdv)


def _check(n, input_dim, hidden_dim, key):
    k_x, k_w = jax.random.split(key)
    x = jax.random.normal(k_x, (n, input_dim), dtype=jnp.float32)
    w = make_weight(k_w, input_dim, hidden_dim)

    a = jax.block_until_ready(jax.jit(adjacency_forward)(x, w))

    h_ref = x @ w
    a_ref = jax.nn.softmax(h_ref @ h_ref.T, axis=1)
    assert a.shape == (n, n)
    assert jnp.allclose(a, a_ref, atol=3e-5, rtol=3e-5), (
        f"mismatch: max abs diff {float(jnp.max(jnp.abs(a - a_ref)))}")


if __name__ == "__main__":
    key = jax.random.PRNGKey(0)
    k1, k2 = jax.random.split(key)

    # Small module-scale shapes (exercise the padding + masking path).
    _check(n=8, input_dim=32, hidden_dim=16, key=k1)

    # Larger lane-dense-ish shapes (exercise the multi-tile grid: 3x3 tiles).
    _check(n=384, input_dim=96, hidden_dim=64, key=k2)

    print("KERNEL_OK")
</pallas_src>

<mosaic_0001>
module attributes {stable_mosaic.version = 11 : i64} {
  func.func @_projection_kernel(%arg0: i32, %arg1: memref<128x128xf32, #tpu.memory_space<vmem>>, %arg2: memref<128x128xf32, #tpu.memory_space<vmem>>, %arg3: memref<128x128xf32, #tpu.memory_space<vmem>>) attributes {dimension_semantics = [#tpu.dimension_semantics<parallel>], iteration_bounds = array<i64: 1>, scalar_prefetch = 0 : i64, scratch_operands = 0 : i64, tpu.core_type = #tpu.core_type<tc>, window_params = [{transform_indices = @transform_0, window_bounds = array<i64: 128, 128>}, {pipeline_mode = #tpu.pipeline_mode<synchronous>, transform_indices = @transform_1, window_bounds = array<i64: 128, 128>}, {transform_indices = @transform_2, window_bounds = array<i64: 128, 128>}]} {
    %c0 = arith.constant 0 : index
    %c0_0 = arith.constant 0 : index
    %0 = vector.load %arg1[%c0, %c0_0] : memref<128x128xf32, #tpu.memory_space<vmem>>, vector<128x128xf32>
    %c0_1 = arith.constant 0 : index
    %c0_2 = arith.constant 0 : index
    %1 = vector.load %arg2[%c0_1, %c0_2] : memref<128x128xf32, #tpu.memory_space<vmem>>, vector<128x128xf32>
    %cst = arith.constant dense<0.000000e+00> : vector<128x128xf32>
    %2 = tpu.matmul %0, %1, %cst {dimension_numbers = #tpu.dot_dimension_numbers<[1], [0], [0], [1], [0, 0, 1, 1], [], []>} : vector<128x128xf32>, vector<128x128xf32>, vector<128x128xf32> -> vector<128x128xf32>
    %c0_3 = arith.constant 0 : index
    %c0_4 = arith.constant 0 : index
    %3 = vector.load %arg3[%c0_3, %c0_4] : memref<128x128xf32, #tpu.memory_space<vmem>>, vector<128x128xf32>
    tpu.vector_store %arg3[%c0_3, %c0_4], %2 {strides = array<i32>} : memref<128x128xf32, #tpu.memory_space<vmem>>, vector<128x128xf32>,
    return
  }
  func.func @transform_0(%arg0: i32) -> (i32, i32) {
    %c0_i32 = arith.constant 0 : i32
    %c0_i32_0 = arith.constant 0 : i32
    return %arg0, %c0_i32 : i32, i32
  }
  func.func @transform_1(%arg0: i32) -> (i32, i32) {
    %c0_i32 = arith.constant 0 : i32
    %c0_i32_0 = arith.constant 0 : i32
    %c0_i32_1 = arith.constant 0 : i32
    return %c0_i32, %c0_i32_0 : i32, i32
  }
  func.func @transform_2(%arg0: i32) -> (i32, i32) {
    %c0_i32 = arith.constant 0 : i32
    %c0_i32_0 = arith.constant 0 : i32
    return %arg0, %c0_i32 : i32, i32
  }
}

module attributes {stable_mosaic.version = 11 : i64} {
  func.func @_adjacency_kernel(%arg0: i32, %arg1: i32, %arg2: memref<128x128xf32, #tpu.memory_space<vmem>>, %arg3: memref<128x128xf32, #tpu.memory_space<vmem>>, %arg4: memref<128x128xf32, #tpu.memory_space<vmem>>) attributes {dimension_semantics = [#tpu.dimension_semantics<parallel>, #tpu.dimension_semantics<arbitrary>], iteration_bounds = array<i64: 1, 1>, scalar_prefetch = 0 : i64, scratch_operands = 0 : i64, tpu.core_type = #tpu.core_type<tc>, window_params = [{transform_indices = @transform_0, window_bounds = array<i64: 128, 128>}, {transform_indices = @transform_1, window_bounds = array<i64: 128, 128>}, {transform_indices = @transform_2, window_bounds = array<i64: 128, 128>}]} {
    %c0 = arith.constant 0 : index
    %c0_0 = arith.constant 0 : index
    %0 = vector.load %arg2[%c0, %c0_0] : memref<128x128xf32, #tpu.memory_space<vmem>>, vector<128x128xf32>
    %c0_1 = arith.constant 0 : index
    %c0_2 = arith.constant 0 : index
    %1 = vector.load %arg3[%c0_1, %c0_2] : memref<128x128xf32, #tpu.memory_space<vmem>>, vector<128x128xf32>
    %cst = arith.constant dense<0.000000e+00> : vector<128x128xf32>
    %2 = tpu.matmul %0, %1, %cst {dimension_numbers = #tpu.dot_dimension_numbers<[1], [1], [0], [0], [0, 0, 1, 0], [], []>} : vector<128x128xf32>, vector<128x128xf32>, vector<128x128xf32> -> vector<128x128xf32>
    %c128_i32 = arith.constant 128 : i32
    %3 = arith.muli %arg1, %c128_i32 : i32
    %4 = tpu.assume_multiple %3, 128 : i32
    %c0_3 = arith.constant 0 : index
    %5 = arith.index_cast %4 : i32 to index
    %6 = vector.load %arg4[%c0_3, %5] : memref<128x128xf32, #tpu.memory_space<vmem>>, vector<128x128xf32>
    tpu.vector_store %arg4[%c0_3, %5], %2 {strides = array<i32>} : memref<128x128xf32, #tpu.memory_space<vmem>>, vector<128x128xf32>,
    %c0_i32 = arith.constant 0 : i32
    %7 = arith.cmpi eq, %arg1, %c0_i32 : i32
    %8 = arith.extui %7 : i1 to i32
    %c0_i32_4 = arith.constant 0 : i32
    %9 = arith.cmpi ne, %8, %c0_i32_4 : i32
    scf.if %9 {
      %c0_5 = arith.constant 0 : index
      %c0_6 = arith.constant 0 : index
      %10 = vector.load %arg4[%c0_5, %c0_6] : memref<128x128xf32, #tpu.memory_space<vmem>>, vector<128x128xf32>
      %11 = tpu.iota {dimensions = array<i32: 1>} : vector<128x128xi32>
      %c8_i32 = arith.constant 8 : i32
      %12 = vector.broadcast %c8_i32 : i32 to vector<128x128xi32>
      %13 = arith.cmpi slt, %11, %12 : vector<128x128xi32>
      %cst_7 = arith.constant -1.000000e+30 : f32
      %14 = vector.broadcast %cst_7 : f32 to vector<128x128xf32>
      %15 = arith.select %13, %10, %14 : vector<128x128xi1>, vector<128x128xf32>
      %cst_8 = arith.constant dense<0xFF800000> : vector<128xf32>
      %16 = vector.multi_reduction <maximumf>, %15, %cst_8 [1] : vector<128x128xf32> to vector<128xf32>
      %17 = vector.shape_cast %16 : vector<128xf32> to vector<128x1xf32>
      %18 = vector.broadcast %17 : vector<128x1xf32> to vector<128x128xf32>
      %19 = arith.subf %15, %18 : vector<128x128xf32>
      %20 = math.exp %19 : vector<128x128xf32>
      %cst_9 = arith.constant dense<0.000000e+00> : vector<128xf32>
      %21 = vector.multi_reduction <add>, %20, %cst_9 [1] : vector<128x128xf32> to vector<128xf32>
      %22 = vector.shape_cast %21 : vector<128xf32> to vector<128x1xf32>
      %23 = tpu.reciprocal %22 {approx = true} : vector<128x1xf32> -> vector<128x1xf32>
      %24 = arith.mulf %22, %23 : vector<128x1xf32>
      %cst_10 = arith.constant 2.000000e+00 : f32
      %25 = vector.broadcast %cst_10 : f32 to vector<128x1xf32>
      %26 = arith.subf %25, %24 : vector<128x1xf32>
      %27 = arith.mulf %23, %26 : vector<128x1xf32>
      %28 = vector.broadcast %27 : vector<128x1xf32> to vector<128x128xf32>
      %29 = arith.mulf %20, %28 : vector<128x128xf32>
      %c0_11 = arith.constant 0 : index
      %c0_12 = arith.constant 0 : index
      %30 = vector.load %arg4[%c0_11, %c0_12] : memref<128x128xf32, #tpu.memory_space<vmem>>, vector<128x128xf32>
      tpu.vector_store %arg4[%c0_11, %c0_12], %29 {strides = array<i32>} : memref<128x128xf32, #tpu.memory_space<vmem>>, vector<128x128xf32>,
    } else {
    }
    return
  }
  func.func @transform_0(%arg0: i32, %arg1: i32) -> (i32, i32) {
    %c0_i32 = arith.constant 0 : i32
    %c0_i32_0 = arith.constant 0 : i32
    return %arg0, %c0_i32 : i32, i32
  }
  func.func @transform_1(%arg0: i32, %arg1: i32) -> (i32, i32) {
    %c0_i32 = arith.constant 0 : i32
    %c0_i32_0 = arith.constant 0 : i32
    return %arg1, %c0_i32 : i32, i32
  }
  func.func @transform_2(%arg0: i32, %arg1: i32) -> (i32, i32) {
    %c0_i32 = arith.constant 0 : i32
    %c0_i32_0 = arith.constant 0 : i32
    return %arg0, %c0_i32 : i32, i32
  }
}

</mosaic_0001>

<bundles_post_ra>
// kernel: adjacency_forward.2
= control target key start
LH: loop header
LB: loop body
LE: loop exit
PB: predicated region body
PF: predicated region fallthrough
CT: control target
= control target key end

     0   :  { %s503_s1 = inlined_call_operand.vmem [shape: f32[128,128], index: 1, kind: input, shape index: {}]   ;;  %s504_s0 = inlined_call_operand.vmem [shape: f32[128,128], index: 0, kind: input, shape index: {}]   ;;  %s505_s2 = inlined_call_operand.vmem [shape: f32[128,128], index: 2, kind: output, shape index: {}]  }
   0x1   :  { %v27_v0 = vld [vmem:[%s503_s1] sm:$0xff]  ;;  %v28_v1 = vld [vmem:[%s503_s1 + $0x8] sm:$0xff]  ;;  %v29_v2 = vld [vmem:[%s503_s1 + $0x10] sm:$0xff] }
   0x2   :  { %v296_v3 = vpack.c.bf16 %v28_v1, %v27_v0  ;;  %v30_v4 = vld [vmem:[%s503_s1 + $0x18] sm:$0xff]  ;;  %v31_v6 = vld [vmem:[%s503_s1 + $0x20] sm:$0xff]  ;;  %v32_v7 = vld [vmem:[%s503_s1 + $0x28] sm:$0xff] }
   0x3   :  { %v300_v5 = vpack.c.bf16 %v30_v4, %v29_v2  ;;  %v304_v8 = vpack.c.bf16 %v32_v7, %v31_v6  ;;  %v11_v9 = vld [vmem:[%s504_s0] sm:$0xff]  ;;  %v33_v11 = vld [vmem:[%s503_s1 + $0x30] sm:$0xff]  ;;  %v34_v12 = vld [vmem:[%s503_s1 + $0x38] sm:$0xff] }
   0x4   :  { %297 = vmatprep.subr.bf16.mxu0 %v296_v3  ;;  %328 = vmatprep.subr.bf16.mxu1 %v296_v3  ;;  %v19_v10 = vld [vmem:[%s504_s0 + $0x40] sm:$0xff]  ;;  %v308_v13 = vpack.c.bf16 %v34_v12, %v33_v11  ;;  %v36_v15 = vld [vmem:[%s503_s1 + $0x48] sm:$0xff]  ;;  %v37_v17 = vld [vmem:[%s503_s1 + $0x50] sm:$0xff] }
   0x5   :  { %299 = vmatpush3.bf16.msra.mxu0 %v296_v3  ;;  %336 = vmatpush3.bf16.msra.mxu1 %v296_v3  ;;  %v35_v14 = vld [vmem:[%s503_s1 + $0x40] sm:$0xff]  ;;  %v38_v18 = vld [vmem:[%s503_s1 + $0x58] sm:$0xff]  ;;  %v40_v21 = vld [vmem:[%s503_s1 + $0x68] sm:$0xff] }
   0x6   :  { %301 = vmatprep.subr.bf16.mxu0 %v300_v5  ;;  %329 = vmatprep.subr.bf16.mxu1 %v300_v5  ;;  %v312_v16 = vpack.c.bf16 %v36_v15, %v35_v14  ;;  %v316_v19 = vpack.c.bf16 %v38_v18, %v37_v17  ;;  %v39_v20 = vld [vmem:[%s503_s1 + $0x60] sm:$0xff]  ;;  %v41_v23 = vld [vmem:[%s503_s1 + $0x70] sm:$0xff]  ;;  %v42_v24 = vld [vmem:[%s503_s1 + $0x78] sm:$0xff] }
   0x7   :  { %272 = vmatprep.mubr.f32.mxu0 %v11_v9  ;;  %284 = vmatprep.mubr.f32.mxu1 %v19_v10  ;;  %v320_v22 = vpack.c.bf16 %v40_v21, %v39_v20  ;;  %v324_v25 = vpack.c.bf16 %v42_v24, %v41_v23  ;;  %v12_v26 = vld [vmem:[%s504_s0 + $0x8] sm:$0xff]  ;;  %v13_v28 = vld [vmem:[%s504_s0 + $0x10] sm:$0xff]  ;;  %v14_v30 = vld [vmem:[%s504_s0 + $0x18] sm:$0xff] }
   0x8   :  { %v20_v27 = vld [vmem:[%s504_s0 + $0x48] sm:$0xff]  ;;  %v21_v29 = vld [vmem:[%s504_s0 + $0x50] sm:$0xff]  ;;  %v22_v31 = vld [vmem:[%s504_s0 + $0x58] sm:$0xff] }
   0x9   :  { %303 = vmatpush3.bf16.msra.mxu0 %v300_v5  ;;  %337 = vmatpush3.bf16.msra.mxu1 %v300_v5  ;;  %v15_v32 = vld [vmem:[%s504_s0 + $0x20] sm:$0xff]  ;;  %v16_v34 = vld [vmem:[%s504_s0 + $0x28] sm:$0xff]  ;;  %v17_v36 = vld [vmem:[%s504_s0 + $0x30] sm:$0xff] }
   0xa   :  { %305 = vmatprep.subr.bf16.mxu0 %v304_v8  ;;  %330 = vmatprep.subr.bf16.mxu1 %v304_v8  ;;  %v23_v33 = vld [vmem:[%s504_s0 + $0x60] sm:$0xff]  ;;  %v24_v35 = vld [vmem:[%s504_s0 + $0x68] sm:$0xff]  ;;  %v25_v37 = vld [vmem:[%s504_s0 + $0x70] sm:$0xff] }
   0xb   :  { %v18_v38 = vld [vmem:[%s504_s0 + $0x38] sm:$0xff] }
   0xc   :  { %v26_v39 = vld [vmem:[%s504_s0 + $0x78] sm:$0xff] }
   0xd   :  { %307 = vmatpush3.bf16.msra.mxu0 %v304_v8  ;;  %338 = vmatpush3.bf16.msra.mxu1 %v304_v8 }
   0xe   :  { %309 = vmatprep.subr.bf16.mxu0 %v308_v13  ;;  %331 = vmatprep.subr.bf16.mxu1 %v308_v13 }
  0x11   :  { %311 = vmatpush3.bf16.msra.mxu0 %v308_v13  ;;  %339 = vmatpush3.bf16.msra.mxu1 %v308_v13 }
  0x12   :  { %313 = vmatprep.subr.bf16.mxu0 %v312_v16  ;;  %332 = vmatprep.subr.bf16.mxu1 %v312_v16 }
  0x15   :  { %315 = vmatpush3.bf16.msra.mxu0 %v312_v16  ;;  %340 = vmatpush3.bf16.msra.mxu1 %v312_v16 }
  0x16   :  { %317 = vmatprep.subr.bf16.mxu0 %v316_v19  ;;  %333 = vmatprep.subr.bf16.mxu1 %v316_v19 }
  0x19   :  { %319 = vmatpush3.bf16.msra.mxu0 %v316_v19  ;;  %341 = vmatpush3.bf16.msra.mxu1 %v316_v19 }
  0x1a   :  { %321 = vmatprep.subr.bf16.mxu0 %v320_v22  ;;  %334 = vmatprep.subr.bf16.mxu1 %v320_v22 }
  0x1d   :  { %323 = vmatpush3.bf16.msra.mxu0 %v320_v22  ;;  %342 = vmatpush3.bf16.msra.mxu1 %v320_v22 }
  0x1e   :  { %325 = vmatprep.subr.bf16.mxu0 %v324_v25  ;;  %335 = vmatprep.subr.bf16.mxu1 %v324_v25 }
  0x21   :  { %327 = vmatpush3.bf16.msra.mxu0 %v324_v25  ;;  %343 = vmatpush3.bf16.msra.mxu1 %v324_v25 }
  0x24   :  { %273 = vmatmul.mubr.f32.vlgmr.msra.gmra.mrb[0].mxu0 %v12_v26  ;;  %285 = vmatmul.mubr.f32.vlgmr.msra.gmra.mrb[0].mxu1 %v20_v27 }
  0x25   :  { %275 = vmatprep.mubr.f32.mxu0 %v13_v28  ;;  %287 = vmatprep.mubr.f32.mxu1 %v21_v29 }
  0x28   :  { %276 = vmatmul.mubr.f32.gmra.mrb[2].mxu0 %v14_v30  ;;  %288 = vmatmul.mubr.f32.gmra.mrb[2].mxu1 %v22_v31 }
  0x29   :  { %278 = vmatprep.mubr.f32.mxu0 %v15_v32  ;;  %290 = vmatprep.mubr.f32.mxu1 %v23_v33 }
  0x2c   :  { %279 = vmatmul.mubr.f32.gmra.mrb[4].mxu0 %v16_v34  ;;  %291 = vmatmul.mubr.f32.gmra.mrb[4].mxu1 %v24_v35 }
  0x2d   :  { %281 = vmatprep.mubr.f32.mxu0 %v17_v36  ;;  %293 = vmatprep.mubr.f32.mxu1 %v25_v37 }
  0x30   :  { %282 = vmatmul.mubr.f32.gmra.mrb[6].mxu0 %v18_v38  ;;  %294 = vmatmul.mubr.f32.gmra.mrb[6].mxu1 %v26_v39 }
  0xf7   :  { %v274_v40 = vpop.f32.mrb[0].mxu0  ;;  %v286_v41 = vpop.f32.mrb[0].mxu1 }
  0xf8   :  { %189 = vst [vmem:[%s505_s2 + $0x8] sm:$0xff] %v274_v40  ;;  %197 = vst [vmem:[%s505_s2 + $0x48] sm:$0xff] %v286_v41  ;;  %v109_v42 = vpop.f32.mrb[1].mxu0  ;;  %v149_v43 = vpop.f32.mrb[1].mxu1 }
  0xf9   :  { %188 = vst [vmem:[%s505_s2] sm:$0xff] %v109_v42  ;;  %196 = vst [vmem:[%s505_s2 + $0x40] sm:$0xff] %v149_v43 }
  0xfb   :  { %v277_v44 = vpop.f32.mrb[2].mxu0  ;;  %v289_v45 = vpop.f32.mrb[2].mxu1 }
  0xfc   :  { %191 = vst [vmem:[%s505_s2 + $0x18] sm:$0xff] %v277_v44  ;;  %199 = vst [vmem:[%s505_s2 + $0x58] sm:$0xff] %v289_v45  ;;  %v119_v46 = vpop.f32.mrb[3].mxu0  ;;  %v159_v47 = vpop.f32.mrb[3].mxu1 }
  0xfd   :  { %190 = vst [vmem:[%s505_s2 + $0x10] sm:$0xff] %v119_v46  ;;  %198 = vst [vmem:[%s505_s2 + $0x50] sm:$0xff] %v159_v47 }
  0xff   :  { %v280_v48 = vpop.f32.mrb[4].mxu0  ;;  %v292_v49 = vpop.f32.mrb[4].mxu1 }
 0x100   :  { %193 = vst [vmem:[%s505_s2 + $0x28] sm:$0xff] %v280_v48  ;;  %201 = vst [vmem:[%s505_s2 + $0x68] sm:$0xff] %v292_v49  ;;  %v129_v50 = vpop.f32.mrb[5].mxu0  ;;  %v169_v51 = vpop.f32.mrb[5].mxu1 }
 0x101   :  { %192 = vst [vmem:[%s505_s2 + $0x20] sm:$0xff] %v129_v50  ;;  %200 = vst [vmem:[%s505_s2 + $0x60] sm:$0xff] %v169_v51 }
 0x103   :  { %v283_v52 = vpop.f32.mrb[6].mxu0  ;;  %v295_v53 = vpop.f32.mrb[6].mxu1 }
 0x104   :  { %195 = vst [vmem:[%s505_s2 + $0x38] sm:$0xff] %v283_v52  ;;  %203 = vst [vmem:[%s505_s2 + $0x78] sm:$0xff] %v295_v53  ;;  %v139_v54 = vpop.f32.mrb[7].mxu0  ;;  %v179_v55 = vpop.f32.mrb[7].mxu1 }
 0x105   :  { %194 = vst [vmem:[%s505_s2 + $0x30] sm:$0xff] %v139_v54  ;;  %202 = vst [vmem:[%s505_s2 + $0x70] sm:$0xff] %v179_v55 }

// kernel: adjacency_forward.3
= control target key start
LH: loop header
LB: loop body
LE: loop exit
PB: predicated region body
PF: predicated region fallthrough
CT: control target
= control target key end

     0   :  { %v228_v40 = vlaneseq  ;;  %s919_s1 = inlined_call_operand.vmem [shape: f32[128,128], index: 1, kind: input, shape index: {}, may-alias: {0,1}]   ;;  %s920_s0 = inlined_call_operand.vmem [shape: f32[128,128], index: 0, kind: input, shape index: {}, may-alias: {0,1}]   ;;  %s921_s2 = inlined_call_operand.vmem [shape: f32[128,128], index: 2, kind: output, shape index: {}]  }
   0x1   :  { %v27_v0 = vld [vmem:[%s919_s1] sm:$0xff]  ;;  %v28_v1 = vld [vmem:[%s919_s1 + $0x8] sm:$0xff]  ;;  %v29_v2 = vld [vmem:[%s919_s1 + $0x10] sm:$0xff] }
   0x2   :  { %v548_v3 = vpack.c.bf16 %v28_v1, %v27_v0  ;;  %v30_v4 = vld [vmem:[%s919_s1 + $0x18] sm:$0xff]  ;;  %v11_v6 = vld [vmem:[%s920_s0] sm:$0xff]  ;;  %v32_v9 = vld [vmem:[%s919_s1 + $0x28] sm:$0xff]  ;;  %v229_v41 = vand.u32 127, %v228_v40 }
   0x3   :  { %v552_v5 = vpack.c.bf16 %v30_v4, %v29_v2  ;;  %v19_v7 = vld [vmem:[%s920_s0 + $0x40] sm:$0xff]  ;;  %524 = vmatprep.mubr.f32.mxu0 %v11_v6  ;;  %v33_v11 = vld [vmem:[%s919_s1 + $0x30] sm:$0xff]  ;;  %v34_v12 = vld [vmem:[%s919_s1 + $0x38] sm:$0xff] }
   0x4   :  { %549 = vmatprep.subr.bf16.mxu0 %v548_v3  ;;  %580 = vmatprep.subr.bf16.mxu1 %v548_v3  ;;  %v31_v8 = vld [vmem:[%s919_s1 + $0x20] sm:$0xff]  ;;  %v560_v13 = vpack.c.bf16 %v34_v12, %v33_v11  ;;  %v36_v15 = vld [vmem:[%s919_s1 + $0x48] sm:$0xff]  ;;  %v37_v17 = vld [vmem:[%s919_s1 + $0x50] sm:$0xff]  ;;  %vm230_vm0 = vcmp.lt.s32.totalorder %v229_v41, 8 }
   0x5   :  { %551 = vmatpush3.bf16.xpose.msra.mxu0 %v548_v3  ;;  %588 = vmatpush3.bf16.xpose.msra.mxu1 %v548_v3  ;;  %v556_v10 = vpack.c.bf16 %v32_v9, %v31_v8  ;;  %v35_v14 = vld [vmem:[%s919_s1 + $0x40] sm:$0xff]  ;;  %v38_v18 = vld [vmem:[%s919_s1 + $0x58] sm:$0xff]  ;;  %v40_v21 = vld [vmem:[%s919_s1 + $0x68] sm:$0xff] }
   0x6   :  { %553 = vmatprep.subr.bf16.mxu0 %v552_v5  ;;  %581 = vmatprep.subr.bf16.mxu1 %v552_v5  ;;  %v564_v16 = vpack.c.bf16 %v36_v15, %v35_v14  ;;  %v568_v19 = vpack.c.bf16 %v38_v18, %v37_v17  ;;  %v39_v20 = vld [vmem:[%s919_s1 + $0x60] sm:$0xff]  ;;  %v41_v23 = vld [vmem:[%s919_s1 + $0x70] sm:$0xff]  ;;  %v42_v24 = vld [vmem:[%s919_s1 + $0x78] sm:$0xff] }
   0x7   :  { %536 = vmatprep.mubr.f32.mxu1 %v19_v7  ;;  %v572_v22 = vpack.c.bf16 %v40_v21, %v39_v20  ;;  %v576_v25 = vpack.c.bf16 %v42_v24, %v41_v23  ;;  %v12_v26 = vld [vmem:[%s920_s0 + $0x8] sm:$0xff]  ;;  %v13_v28 = vld [vmem:[%s920_s0 + $0x10] sm:$0xff]  ;;  %v14_v30 = vld [vmem:[%s920_s0 + $0x18] sm:$0xff] }
   0x8   :  { %v20_v27 = vld [vmem:[%s920_s0 + $0x48] sm:$0xff]  ;;  %v21_v29 = vld [vmem:[%s920_s0 + $0x50] sm:$0xff]  ;;  %v22_v31 = vld [vmem:[%s920_s0 + $0x58] sm:$0xff] }
   0x9   :  { %v15_v32 = vld [vmem:[%s920_s0 + $0x20] sm:$0xff]  ;;  %v16_v34 = vld [vmem:[%s920_s0 + $0x28] sm:$0xff]  ;;  %v17_v36 = vld [vmem:[%s920_s0 + $0x30] sm:$0xff] }
   0xa   :  { %v23_v33 = vld [vmem:[%s920_s0 + $0x60] sm:$0xff]  ;;  %v24_v35 = vld [vmem:[%s920_s0 + $0x68] sm:$0xff]  ;;  %v25_v37 = vld [vmem:[%s920_s0 + $0x70] sm:$0xff] }
   0xb   :  { %v18_v38 = vld [vmem:[%s920_s0 + $0x38] sm:$0xff] }
   0xc   :  { %v26_v39 = vld [vmem:[%s920_s0 + $0x78] sm:$0xff] }
   0xd   :  { %555 = vmatpush3.bf16.xpose.msra.mxu0 %v552_v5  ;;  %589 = vmatpush3.bf16.xpose.msra.mxu1 %v552_v5 }
   0xe   :  { %557 = vmatprep.subr.bf16.mxu0 %v556_v10  ;;  %582 = vmatprep.subr.bf16.mxu1 %v556_v10 }
  0x15   :  { %559 = vmatpush3.bf16.xpose.msra.mxu0 %v556_v10  ;;  %590 = vmatpush3.bf16.xpose.msra.mxu1 %v556_v10 }
  0x16   :  { %561 = vmatprep.subr.bf16.mxu0 %v560_v13  ;;  %583 = vmatprep.subr.bf16.mxu1 %v560_v13 }
  0x1d   :  { %563 = vmatpush3.bf16.xpose.msra.mxu0 %v560_v13  ;;  %591 = vmatpush3.bf16.xpose.msra.mxu1 %v560_v13 }
  0x1e   :  { %565 = vmatprep.subr.bf16.mxu0 %v564_v16  ;;  %584 = vmatprep.subr.bf16.mxu1 %v564_v16 }
  0x25   :  { %567 = vmatpush3.bf16.xpose.msra.mxu0 %v564_v16  ;;  %592 = vmatpush3.bf16.xpose.msra.mxu1 %v564_v16 }
  0x26   :  { %569 = vmatprep.subr.bf16.mxu0 %v568_v19  ;;  %585 = vmatprep.subr.bf16.mxu1 %v568_v19 }
  0x2d   :  { %571 = vmatpush3.bf16.xpose.msra.mxu0 %v568_v19  ;;  %593 = vmatpush3.bf16.xpose.msra.mxu1 %v568_v19 }
  0x2e   :  { %573 = vmatprep.subr.bf16.mxu0 %v572_v22  ;;  %586 = vmatprep.subr.bf16.mxu1 %v572_v22 }
  0x35   :  { %575 = vmatpush3.bf16.xpose.msra.mxu0 %v572_v22  ;;  %594 = vmatpush3.bf16.xpose.msra.mxu1 %v572_v22 }
  0x36   :  { %577 = vmatprep.subr.bf16.mxu0 %v576_v25  ;;  %587 = vmatprep.subr.bf16.mxu1 %v576_v25 }
  0x3d   :  { %579 = vmatpush3.bf16.xpose.msra.mxu0 %v576_v25  ;;  %595 = vmatpush3.bf16.xpose.msra.mxu1 %v576_v25 }
  0x44   :  { %525 = vmatmul.mubr.f32.vlgmr.msra.gmra.mrb[0].mxu0 %v12_v26  ;;  %537 = vmatmul.mubr.f32.vlgmr.msra.gmra.mrb[0].mxu1 %v20_v27 }
  0x45   :  { %527 = vmatprep.mubr.f32.mxu0 %v13_v28  ;;  %539 = vmatprep.mubr.f32.mxu1 %v21_v29 }
  0x48   :  { %528 = vmatmul.mubr.f32.gmra.mrb[2].mxu0 %v14_v30  ;;  %540 = vmatmul.mubr.f32.gmra.mrb[2].mxu1 %v22_v31 }
  0x49   :  { %530 = vmatprep.mubr.f32.mxu0 %v15_v32  ;;  %542 = vmatprep.mubr.f32.mxu1 %v23_v33 }
  0x4c   :  { %531 = vmatmul.mubr.f32.gmra.mrb[4].mxu0 %v16_v34  ;;  %543 = vmatmul.mubr.f32.gmra.mrb[4].mxu1 %v24_v35 }
  0x4d   :  { %533 = vmatprep.mubr.f32.mxu0 %v17_v36  ;;  %545 = vmatprep.mubr.f32.mxu1 %v25_v37 }
  0x50   :  { %534 = vmatmul.mubr.f32.gmra.mrb[6].mxu0 %v18_v38  ;;  %546 = vmatmul.mubr.f32.gmra.mrb[6].mxu1 %v26_v39 }
 0x117   :  { %v526_v42 = vpop.f32.mrb[0].mxu0  ;;  %v538_v43 = vpop.f32.mrb[0].mxu1 }
 0x118   :  { %v109_v44 = vpop.f32.mrb[1].mxu0  ;;  %v149_v45 = vpop.f32.mrb[1].mxu1  ;;  %v240_v46 = vsel %vm230_vm0, %v538_v43, -1e+30  ;;  %v232_v47 = vsel %vm230_vm0, %v526_v42, -1e+30 }
 0x119   :  { %265 = vmax.xlane.f32.xlu1 %v240_v46  ;;  %249 = vmax.xlane.f32.xlu0 %v232_v47  ;;  %v231_v52 = vsel %vm230_vm0, %v109_v44, -1e+30  ;;  %v239_v58 = vsel %vm230_vm0, %v149_v45, -1e+30 }
 0x11b   :  { %v529_v48 = vpop.f32.mrb[2].mxu0  ;;  %v541_v49 = vpop.f32.mrb[2].mxu1 }
 0x11c   :  { %v119_v50 = vpop.f32.mrb[3].mxu0  ;;  %v159_v51 = vpop.f32.mrb[3].mxu1  ;;  %v234_v53 = vsel %vm230_vm0, %v529_v48, -1e+30  ;;  %v242_v54 = vsel %vm230_vm0, %v541_v49, -1e+30 }
 0x11d   :  { %247 = vmax.xlane.f32.xlu0 %v231_v52  ;;  %253 = vmax.xlane.f32.xlu1 %v234_v53  ;;  %v241_v62 = vsel %vm230_vm0, %v159_v51, -1e+30  ;;  %v233_v63 = vsel %vm230_vm0, %v119_v50, -1e+30 }
 0x11f   :  { %v532_v55 = vpop.f32.mrb[4].mxu0  ;;  %v544_v56 = vpop.f32.mrb[4].mxu1 }
 0x120   :  { %v129_v57 = vpop.f32.mrb[5].mxu0  ;;  %v169_v59 = vpop.f32.mrb[5].mxu1  ;;  %v236_v2 = vsel %vm230_vm0, %v532_v55, -1e+30  ;;  %v244_v4 = vsel %vm230_vm0, %v544_v56, -1e+30 }
 0x121   :  { %263 = vmax.xlane.f32.xlu0 %v239_v58  ;;  %269 = vmax.xlane.f32.xlu1 %v242_v54  ;;  %v235_v3 = vsel %vm230_vm0, %v129_v57, -1e+30  ;;  %v783_v5 = vsel %vm230_vm0, %v169_v59, -1e+30 }
 0x123   :  { %v535_v60 = vpop.f32.mrb[6].mxu0  ;;  %v547_v61 = vpop.f32.mrb[6].mxu1 }
 0x124   :  { %v139_v0 = vpop.f32.mrb[7].mxu0  ;;  %v179_v1 = vpop.f32.mrb[7].mxu1  ;;  %v787_v6 = vsel %vm230_vm0, %v535_v60, -1e+30  ;;  %v795_v8 = vsel %vm230_vm0, %v547_v61, -1e+30 }
 0x125   :  { %267 = vmax.xlane.f32.xlu0 %v241_v62  ;;  %251 = vmax.xlane.f32.xlu1 %v233_v63  ;;  %v790_v7 = vsel %vm230_vm0, %v139_v0, -1e+30  ;;  %v798_v9 = vsel %vm230_vm0, %v179_v1, -1e+30 }
 0x129   :  { %257 = vmax.xlane.f32.xlu1 %v236_v2  ;;  %255 = vmax.xlane.f32.xlu0 %v235_v3 }
 0x12d   :  { %273 = vmax.xlane.f32.xlu1 %v244_v4  ;;  %271 = vmax.xlane.f32.xlu0 %v783_v5 }
 0x131   :  { %261 = vmax.xlane.f32.xlu1 %v787_v6  ;;  %259 = vmax.xlane.f32.xlu0 %v790_v7 }
 0x135   :  { %277 = vmax.xlane.f32.xlu1 %v795_v8  ;;  %275 = vmax.xlane.f32.xlu0 %v798_v9 }
 0x1a6   :  { %v266_v10 = vpop.xlane.xlu1 %265  ;;  %v250_v11 = vpop.xlane.xlu0 %249 }
 0x1a7   :  { %v280_v12 = vsub.f32 %v232_v47, %v250_v11  ;;  %v288_v13 = vsub.f32 %v240_v46, %v266_v10 }
 0x1a9   :  { %v297_v14 = vmul.f32 1.442695, %v280_v12  ;;  %v313_v18 = vmul.f32 1.442695, %v288_v13 }
 0x1aa   :  { %v248_v15 = vpop.xlane.xlu0 %247  ;;  %v254_v16 = vpop.xlane.xlu1 %253 }
 0x1ab   :  { %v279_v17 = vsub.f32 %v231_v52, %v248_v15  ;;  %596 = vpow2.f32 %v297_v14  ;;  %v282_v19 = vsub.f32 %v234_v53, %v254_v16 }
 0x1ad   :  { %v295_v20 = vmul.f32 1.442695, %v279_v17  ;;  %v301_v25 = vmul.f32 1.442695, %v282_v19 }
 0x1ae   :  { %v264_v21 = vpop.xlane.xlu0 %263  ;;  %v270_v22 = vpop.xlane.xlu1 %269 }
 0x1af   :  { %598 = vpow2.f32 %v295_v20  ;;  %v287_v23 = vsub.f32 %v239_v58, %v264_v21  ;;  %v290_v24 = vsub.f32 %v242_v54, %v270_v22 }
 0x1b0   :  { %600 = vpow2.f32 %v313_v18 }
 0x1b1   :  { %v311_v26 = vmul.f32 1.442695, %v287_v23  ;;  %v317_v29 = vmul.f32 1.442695, %v290_v24 }
 0x1b2   :  { %v268_v27 = vpop.xlane.xlu0 %267  ;;  %v252_v28 = vpop.xlane.xlu1 %251 }
 0x1b3   :  { %602 = vpow2.f32 %v311_v26  ;;  %v281_v30 = vsub.f32 %v233_v63, %v252_v28  ;;  %v289_v31 = vsub.f32 %v241_v62, %v268_v27 }
 0x1b4   :  { %604 = vpow2.f32 %v301_v25 }
 0x1b5   :  { %v299_v32 = vmul.f32 1.442695, %v281_v30  ;;  %v802_v33 = vpop.eup %596  ;;  %606 = vpow2.f32 %v317_v29  ;;  %v315_v37 = vmul.f32 1.442695, %v289_v31 }
 0x1b6   :  { %v258_v34 = vpop.xlane.xlu1 %257  ;;  %v256_v35 = vpop.xlane.xlu0 %255  ;;  %329 = vadd.xlane.f32.xlu1 %v802_v33 }
 0x1b7   :  { %v284_v36 = vsub.f32 %v236_v2, %v258_v34  ;;  %608 = vpow2.f32 %v299_v32  ;;  %v283_v38 = vsub.f32 %v235_v3, %v256_v35 }
 0x1b9   :  { %v805_v39 = vpop.eup %598  ;;  %v305_v40 = vmul.f32 1.442695, %v284_v36  ;;  %v303_v45 = vmul.f32 1.442695, %v283_v38 }
 0x1ba   :  { %v807_v41 = vpop.eup %600  ;;  %v274_v42 = vpop.xlane.xlu1 %273  ;;  %327 = vadd.xlane.f32.xlu0 %v805_v39 }
 0x1bb   :  { %v272_v43 = vpop.xlane.xlu0 %271  ;;  %610 = vpow2.f32 %v305_v40  ;;  %v292_v44 = vsub.f32 %v244_v4, %v274_v42  ;;  %345 = vadd.xlane.f32.xlu1 %v807_v41 }
 0x1bc   :  { %612 = vpow2.f32 %v315_v37  ;;  %v291_v46 = vsub.f32 %v783_v5, %v272_v43 }
 0x1bd   :  { %v812_v47 = vpop.eup %602  ;;  %v321_v48 = vmul.f32 1.442695, %v292_v44 }
 0x1be   :  { %v814_v49 = vpop.eup %604  ;;  %v262_v50 = vpop.xlane.xlu1 %261  ;;  %343 = vadd.xlane.f32.xlu0 %v812_v47  ;;  %v319_v53 = vmul.f32 1.442695, %v291_v46 }
 0x1bf   :  { %v260_v51 = vpop.xlane.xlu0 %259  ;;  %614 = vpow2.f32 %v321_v48  ;;  %333 = vadd.xlane.f32.xlu1 %v814_v49  ;;  %v286_v52 = vsub.f32 %v787_v6, %v262_v50  ;;  %v820_v55 = vpop.eup %606 }
 0x1c0   :  { %616 = vpow2.f32 %v303_v45  ;;  %v285_v54 = vsub.f32 %v790_v7, %v260_v51 }
 0x1c1   :  { %v309_v56 = vmul.f32 1.442695, %v286_v52  ;;  %v822_v57 = vpop.eup %608 }
 0x1c2   :  { %v278_v58 = vpop.xlane.xlu1 %277  ;;  %331 = vadd.xlane.f32.xlu0 %v822_v57  ;;  %v307_v61 = vmul.f32 1.442695, %v285_v54 }
 0x1c3   :  { %v276_v59 = vpop.xlane.xlu0 %275  ;;  %618 = vpow2.f32 %v309_v56  ;;  %349 = vadd.xlane.f32.xlu1 %v820_v55  ;;  %v294_v60 = vsub.f32 %v795_v8, %v278_v58 }
 0x1c4   :  { %620 = vpow2.f32 %v319_v53  ;;  %v293_v62 = vsub.f32 %v798_v9, %v276_v59 }
 0x1c5   :  { %v828_v63 = vpop.eup %610  ;;  %v325_v0 = vmul.f32 1.442695, %v294_v60 }
 0x1c6   :  { %v830_v1 = vpop.eup %612  ;;  %v323_v2 = vmul.f32 1.442695, %v293_v62 }
 0x1c7   :  { %622 = vpow2.f32 %v325_v0  ;;  %337 = vadd.xlane.f32.xlu1 %v828_v63  ;;  %347 = vadd.xlane.f32.xlu0 %v830_v1 }
 0x1c8   :  { %624 = vpow2.f32 %v307_v61 }
 0x1c9   :  { %v834_v3 = vpop.eup %614  ;;  %626 = vpow2.f32 %v323_v2 }
 0x1ca   :  { %v836_v4 = vpop.eup %616 }
 0x1cb   :  { %353 = vadd.xlane.f32.xlu1 %v834_v3  ;;  %335 = vadd.xlane.f32.xlu0 %v836_v4 }
 0x1cd   :  { %v840_v5 = vpop.eup %618 }
 0x1ce   :  { %v842_v6 = vpop.eup %620 }
 0x1cf   :  { %341 = vadd.xlane.f32.xlu1 %v840_v5  ;;  %351 = vadd.xlane.f32.xlu0 %v842_v6 }
 0x1d1   :  { %v846_v7 = vpop.eup %622 }
 0x1d2   :  { %v848_v8 = vpop.eup %624 }
 0x1d3   :  { %357 = vadd.xlane.f32.xlu1 %v846_v7  ;;  %339 = vadd.xlane.f32.xlu0 %v848_v8  ;;  %v852_v9 = vpop.eup %626 }
 0x1d7   :  { %355 = vadd.xlane.f32.xlu0 %v852_v9 }
 0x243   :  { %v330_v10 = vpop.xlane.xlu1 %329 }
 0x244   :  { %628 = vrcp.f32 %v330_v10 }
 0x247   :  { %v328_v11 = vpop.xlane.xlu0 %327 }
 0x248   :  { %v346_v12 = vpop.xlane.xlu1 %345  ;;  %630 = vrcp.f32 %v328_v11 }
 0x249   :  { %632 = vrcp.f32 %v346_v12 }
 0x24b   :  { %v344_v13 = vpop.xlane.xlu0 %343 }
 0x24c   :  { %v334_v14 = vpop.xlane.xlu1 %333  ;;  %634 = vrcp.f32 %v344_v13 }
 0x24d   :  { %636 = vrcp.f32 %v334_v14 }
 0x24e   :  { %v629_v15 = vpop.eup %628 }
 0x24f   :  { %v376_v16 = vmul.f32 %v629_v15, %v330_v10  ;;  %v332_v18 = vpop.xlane.xlu0 %331 }
 0x250   :  { %v350_v17 = vpop.xlane.xlu1 %349 }
 0x251   :  { %638 = vrcp.f32 %v350_v17  ;;  %v392_v20 = vsub.f32 2.0, %v376_v16 }
 0x252   :  { %v631_v19 = vpop.eup %630  ;;  %640 = vrcp.f32 %v332_v18 }
 0x253   :  { %v633_v21 = vpop.eup %632  ;;  %v375_v22 = vmul.f32 %v631_v19, %v328_v11  ;;  %v408_v23 = vmul.f32 %v629_v15, %v392_v20 }
 0x254   :  { %v384_v24 = vmul.f32 %v633_v21, %v346_v12  ;;  %v338_v25 = vpop.xlane.xlu1 %337  ;;  %v348_v26 = vpop.xlane.xlu0 %347 }
 0x255   :  { %v391_v27 = vsub.f32 2.0, %v375_v22  ;;  %642 = vrcp.f32 %v338_v25  ;;  %v424_v29 = vmul.f32 %v802_v33, %v408_v23 }
 0x256   :  { %v635_v28 = vpop.eup %634  ;;  %v400_v30 = vsub.f32 2.0, %v384_v24  ;;  %644 = vrcp.f32 %v348_v26 }
 0x257   :  { %v637_v31 = vpop.eup %636  ;;  %v407_v32 = vmul.f32 %v631_v19, %v391_v27  ;;  %v383_v34 = vmul.f32 %v635_v28, %v344_v13  ;;  %440 = vst [vmem:[%s921_s2 + $0x8] sm:$0xff] %v424_v29 }
 0x258   :  { %v416_v35 = vmul.f32 %v633_v21, %v400_v30  ;;  %v378_v36 = vmul.f32 %v637_v31, %v334_v14  ;;  %v354_v37 = vpop.xlane.xlu1 %353  ;;  %v336_v38 = vpop.xlane.xlu0 %335 }
 0x259   :  { %v423_v40 = vmul.f32 %v805_v39, %v407_v32  ;;  %v399_v42 = vsub.f32 2.0, %v383_v34  ;;  %646 = vrcp.f32 %v354_v37 }
 0x25a   :  { %v432_v43 = vmul.f32 %v807_v41, %v416_v35  ;;  %v394_v33 = vsub.f32 2.0, %v378_v36  ;;  %648 = vrcp.f32 %v336_v38 }
 0x25b   :  { %v639_v44 = vpop.eup %638  ;;  %439 = vst [vmem:[%s921_s2] sm:$0xff] %v423_v40  ;;  %v415_v45 = vmul.f32 %v635_v28, %v399_v42 }
 0x25c   :  { %v641_v46 = vpop.eup %640  ;;  %448 = vst [vmem:[%s921_s2 + $0x48] sm:$0xff] %v432_v43  ;;  %v410_v48 = vmul.f32 %v637_v31, %v394_v33  ;;  %v386_v50 = vmul.f32 %v639_v44, %v350_v17  ;;  %v342_v39 = vpop.xlane.xlu1 %341 }
 0x25d   :  { %v352_v51 = vpop.xlane.xlu0 %351  ;;  %v431_v52 = vmul.f32 %v812_v47, %v415_v45  ;;  %v377_v41 = vmul.f32 %v641_v46, %v332_v18  ;;  %650 = vrcp.f32 %v342_v39 }
 0x25e   :  { %v426_v53 = vmul.f32 %v814_v49, %v410_v48  ;;  %v402_v54 = vsub.f32 2.0, %v386_v50  ;;  %652 = vrcp.f32 %v352_v51 }
 0x25f   :  { %v643_v56 = vpop.eup %642  ;;  %447 = vst [vmem:[%s921_s2 + $0x40] sm:$0xff] %v431_v52  ;;  %v393_v58 = vsub.f32 2.0, %v377_v41 }
 0x260   :  { %v645_v59 = vpop.eup %644  ;;  %442 = vst [vmem:[%s921_s2 + $0x18] sm:$0xff] %v426_v53  ;;  %v418_v60 = vmul.f32 %v639_v44, %v402_v54  ;;  %v380_v61 = vmul.f32 %v643_v56, %v338_v25  ;;  %v358_v47 = vpop.xlane.xlu1 %357 }
 0x261   :  { %v340_v62 = vpop.xlane.xlu0 %339  ;;  %v409_v0 = vmul.f32 %v641_v46, %v393_v58  ;;  %v385_v2 = vmul.f32 %v645_v59, %v348_v26  ;;  %654 = vrcp.f32 %v358_v47 }
 0x262   :  { %v434_v49 = vmul.f32 %v820_v55, %v418_v60  ;;  %v396_v10 = vsub.f32 2.0, %v380_v61  ;;  %656 = vrcp.f32 %v340_v62 }
 0x263   :  { %v647_v11 = vpop.eup %646  ;;  %v425_v12 = vmul.f32 %v822_v57, %v409_v0  ;;  %v401_v13 = vsub.f32 2.0, %v385_v2 }
 0x264   :  { %v649_v14 = vpop.eup %648  ;;  %450 = vst [vmem:[%s921_s2 + $0x58] sm:$0xff] %v434_v49  ;;  %v412_v15 = vmul.f32 %v643_v56, %v396_v10  ;;  %v388_v16 = vmul.f32 %v647_v11, %v354_v37 }
 0x265   :  { %v356_v17 = vpop.xlane.xlu0 %355  ;;  %441 = vst [vmem:[%s921_s2 + $0x10] sm:$0xff] %v425_v12  ;;  %v417_v18 = vmul.f32 %v645_v59, %v401_v13  ;;  %v379_v55 = vmul.f32 %v649_v14, %v336_v38 }
 0x266   :  { %658 = vrcp.f32 %v356_v17  ;;  %v428_v19 = vmul.f32 %v828_v63, %v412_v15  ;;  %v404_v20 = vsub.f32 2.0, %v388_v16 }
 0x267   :  { %v651_v57 = vpop.eup %650  ;;  %v433_v21 = vmul.f32 %v830_v1, %v417_v18  ;;  %v395_v22 = vsub.f32 2.0, %v379_v55 }
 0x268   :  { %v653_v23 = vpop.eup %652  ;;  %444 = vst [vmem:[%s921_s2 + $0x28] sm:$0xff] %v428_v19  ;;  %v420_v24 = vmul.f32 %v647_v11, %v404_v20  ;;  %v382_v25 = vmul.f32 %v651_v57, %v342_v39 }
 0x269   :  { %449 = vst [vmem:[%s921_s2 + $0x50] sm:$0xff] %v433_v21  ;;  %v411_v26 = vmul.f32 %v649_v14, %v395_v22  ;;  %v387_v27 = vmul.f32 %v653_v23, %v352_v51 }
 0x26a   :  { %v436_v63 = vmul.f32 %v834_v3, %v420_v24  ;;  %v398_v28 = vsub.f32 2.0, %v382_v25 }
 0x26b   :  { %v655_v29 = vpop.eup %654  ;;  %v427_v1 = vmul.f32 %v836_v4, %v411_v26  ;;  %v403_v30 = vsub.f32 2.0, %v387_v27 }
 0x26c   :  { %v657_v31 = vpop.eup %656  ;;  %452 = vst [vmem:[%s921_s2 + $0x68] sm:$0xff] %v436_v63  ;;  %v414_v32 = vmul.f32 %v651_v57, %v398_v28  ;;  %v390_v34 = vmul.f32 %v655_v29, %v358_v47 }
 0x26d   :  { %443 = vst [vmem:[%s921_s2 + $0x20] sm:$0xff] %v427_v1  ;;  %v419_v35 = vmul.f32 %v653_v23, %v403_v30  ;;  %v381_v36 = vmul.f32 %v657_v31, %v340_v62 }
 0x26e   :  { %v430_v3 = vmul.f32 %v840_v5, %v414_v32  ;;  %v406_v37 = vsub.f32 2.0, %v390_v34 }
 0x26f   :  { %v435_v4 = vmul.f32 %v842_v6, %v419_v35  ;;  %v397_v40 = vsub.f32 2.0, %v381_v36 }
 0x270   :  { %v659_v38 = vpop.eup %658  ;;  %446 = vst [vmem:[%s921_s2 + $0x38] sm:$0xff] %v430_v3  ;;  %v422_v42 = vmul.f32 %v655_v29, %v406_v37 }
 0x271   :  { %v389_v43 = vmul.f32 %v659_v38, %v356_v17  ;;  %451 = vst [vmem:[%s921_s2 + $0x60] sm:$0xff] %v435_v4  ;;  %v413_v33 = vmul.f32 %v657_v31, %v397_v40 }
 0x272   :  { %v438_v44 = vmul.f32 %v846_v7, %v422_v42 }
 0x273   :  { %v405_v45 = vsub.f32 2.0, %v389_v43  ;;  %v429_v5 = vmul.f32 %v848_v8, %v413_v33 }
 0x274   :  { %454 = vst [vmem:[%s921_s2 + $0x78] sm:$0xff] %v438_v44 }
 0x275   :  { %v421_v6 = vmul.f32 %v659_v38, %v405_v45  ;;  %445 = vst [vmem:[%s921_s2 + $0x30] sm:$0xff] %v429_v5 }
 0x277   :  { %v437_v46 = vmul.f32 %v852_v9, %v421_v6 }
 0x279   :  { %453 = vst [vmem:[%s921_s2 + $0x70] sm:$0xff] %v437_v46 }

</bundles_post_ra>
